<compile_context>
chip_gen: v5e
topology: v5e:2x2
jax: 0.10.0
libtpu: 0.0.40
codegen_flags: <defaults>
</compile_context>

<pallas_src>
import functools

import jax
import jax.numpy as jnp
from jax.experimental import pallas as pl
from jax.experimental.pallas import tpu as pltpu

_LANE = 128


def _cdiv(a, b):
    return (a + b - 1) // b


def _round_up(x, m):
    return _cdiv(x, m) * m


def _pad2d(a, rows, cols):
    r, c = a.shape
    if r == rows and c == cols:
        return a
    return jnp.pad(a, ((0, rows - r), (0, cols - c)))


def _choose_batch_tile(B, *, max_tile=2048, min_steps=4, min_tile=512):
    """Large tiles to amortize per-step overhead, but keep >= min_steps grid
    steps (2 v7x TCs x >= 2 each) whenever the batch is big enough."""
    B8 = _round_up(B, 8)
    bt = min(max_tile, B8)
    if B8 >= min_steps * min_tile and _cdiv(B8, bt) < min_steps:
        bt = _round_up(_cdiv(B8, min_steps), 8)
    return max(bt, 8)


def _mlp_kernel(x_ref, w1_ref, b1_ref, w2_ref, b2_ref, w3_ref, b3_ref, o_ref,
                *, compute_dtype):
    # One batch tile: 3 MXU matmuls (f32 acc), bias + ReLU in f32 on the VPU.
    x = x_ref[...].astype(compute_dtype)             # in-kernel cast (no extra HBM pass)

    h = jnp.dot(x, w1_ref[...], preferred_element_type=jnp.float32)
    h = jnp.maximum(h + b1_ref[...], 0.0)            # (1, H_p) broadcasts over rows

    h = h.astype(compute_dtype)
    m = jnp.dot(h, w2_ref[...], preferred_element_type=jnp.float32)
    m = jnp.maximum(m + b2_ref[...], 0.0)

    m = m.astype(compute_dtype)
    o = jnp.dot(m, w3_ref[...], preferred_element_type=jnp.float32)
    o_ref[...] = (o + b3_ref[...]).astype(o_ref.dtype)


def smiles_transformer_forward(fp, params, *, batch_tile=None,
                               compute_dtype=jnp.float32,
                               out_dtype=jnp.float32):
    """fp: (B, in_channals) float32. params: dict of w1,b1,w2,b2,w3,b3
    (weights stored pre-transposed as (in_features, out_features))."""
    w1, b1 = params["w1"], params["b1"]
    w2, b2 = params["w2"], params["b2"]
    w3, b3 = params["w3"], params["b3"]

    B, Cin = fp.shape
    H = w1.shape[1]
    M = w2.shape[1]
    Cout = w3.shape[1]

    # Hidden dims (VMEM-only intermediates) lane-padded; Cin / Cout stay true.
    H_p = _round_up(H, _LANE)
    M_p = _round_up(M, _LANE)

    bt = batch_tile if batch_tile is not None else _choose_batch_tile(B)
    assert bt % 8 == 0, "batch_tile must be a multiple of 8"
    B_p = _round_up(B, bt)

    # No cast, no feature padding on the activation (avoid extra HBM passes).
    fp_p = _pad2d(fp, B_p, Cin)

    # Weights: tiny, resident, read once -> cast in the wrapper is fine.
    w1_p = _pad2d(w1, Cin, H_p).astype(compute_dtype)
    w2_p = _pad2d(w2, H_p, M_p).astype(compute_dtype)
    w3_p = _pad2d(w3, M_p, Cout).astype(compute_dtype)
    b1_p = _pad2d(b1, 1, H_p).astype(jnp.float32)
    b2_p = _pad2d(b2, 1, M_p).astype(jnp.float32)
    b3_p = _pad2d(b3, 1, Cout).astype(jnp.float32)

    grid = (B_p // bt,)

    kernel = functools.partial(_mlp_kernel, compute_dtype=compute_dtype)

    out = pl.pallas_call(
        kernel,
        out_shape=jax.ShapeDtypeStruct((B_p, Cout), out_dtype),
        grid_spec=pltpu.PrefetchScalarGridSpec(
            num_scalar_prefetch=0,
            grid=grid,
            in_specs=[
                pl.BlockSpec((bt, Cin), lambda i: (i, 0)),     # fp tile (true Cin)
                pl.BlockSpec((Cin, H_p), lambda i: (0, 0)),    # w1 (resident)
                pl.BlockSpec((1, H_p), lambda i: (0, 0)),      # b1
                pl.BlockSpec((H_p, M_p), lambda i: (0, 0)),    # w2
                pl.BlockSpec((1, M_p), lambda i: (0, 0)),      # b2
                pl.BlockSpec((M_p, Cout), lambda i: (0, 0)),   # w3
                pl.BlockSpec((1, Cout), lambda i: (0, 0)),     # b3
            ],
            out_specs=pl.BlockSpec((bt, Cout), lambda i: (i, 0)),  # true Cout
        ),
        compiler_params=pltpu.CompilerParams(
            dimension_semantics=("parallel",),
        ),
    )(fp_p, w1_p, b1_p, w2_p, b2_p, w3_p, b3_p)

    # Strip batch padding only (no feature-dim slicing needed anymore).
    return out[:B] if B_p != B else out


def init_params(key, in_channals, hidden_channals, mid_channals, out_channals):
    """Deterministic synthetic init (PyTorch-Linear-like uniform ranges)."""
    ks = jax.random.split(key, 6)

    def lin(kw, kb, fan_in, fan_out):
        bound = 1.0 / jnp.sqrt(fan_in)
        # stored transposed: (fan_in, fan_out) so the kernel computes x @ W
        w = jax.random.uniform(kw, (fan_in, fan_out), jnp.float32, -bound, bound)
        b = jax.random.uniform(kb, (1, fan_out), jnp.float32, -bound, bound)
        return w, b

    w1, b1 = lin(ks[0], ks[1], in_channals, hidden_channals)
    w2, b2 = lin(ks[2], ks[3], hidden_channals, mid_channals)
    w3, b3 = lin(ks[4], ks[5], mid_channals, out_channals)
    return {"w1": w1, "b1": b1, "w2": w2, "b2": b2, "w3": w3, "b3": b3}


if __name__ == "__main__":
    # Small shapes consistent with the module: a fingerprint MLP head.
    in_channals, hidden_channals, mid_channals, out_channals = 64, 128, 64, 32
    batch = 8
    drop_p = 0.0  # TODO(synk): drop_p exists in __init__ but forward never uses dropout.

    key = jax.random.PRNGKey(0)
    k_params, k_data = jax.random.split(key)

    params = init_params(k_params, in_channals, hidden_channals,
                         mid_channals, out_channals)

    # X.tsfm_fp equivalent: already flattened to (-1, in_channals).
    fp = jax.random.normal(k_data, (batch, in_channals), jnp.float32)

    # Plain-JAX reference of the same math.
    h = jnp.maximum(fp @ params["w1"] + params["b1"], 0.0)
    m = jnp.maximum(h @ params["w2"] + params["b2"], 0.0)
    ref = m @ params["w3"] + params["b3"]

    # f32 path (exact match to the reference math).
    out = jax.block_until_ready(smiles_transformer_forward(fp, params))
    assert out.shape == (batch, out_channals)
    assert jnp.allclose(out, ref, atol=1e-5, rtol=1e-5)

    # bf16 matmul-input path (MXU fast path on v5e/v6e/v7x), f32 accumulation.
    out_bf16 = jax.block_until_ready(
        smiles_transformer_forward(fp, params, compute_dtype=jnp.bfloat16))
    assert out_bf16.shape == (batch, out_channals)
    assert bool(jnp.max(jnp.abs(out_bf16 - ref)) < 0.25)

    # Non-trivial grid path (multiple batch tiles + ragged last tile).
    big_B = 4096 + 40
    fp_big = jax.random.normal(jax.random.PRNGKey(1), (big_B, in_channals),
                               jnp.float32)
    h = jnp.maximum(fp_big @ params["w1"] + params["b1"], 0.0)
    m = jnp.maximum(h @ params["w2"] + params["b2"], 0.0)
    ref_big = m @ params["w3"] + params["b3"]
    out_big = jax.block_until_ready(smiles_transformer_forward(fp_big, params))
    assert out_big.shape == (big_B, out_channals)
    assert jnp.allclose(out_big, ref_big, atol=1e-4, rtol=1e-4)

    print("KERNEL_OK")
</pallas_src>

<mosaic_0001>
module attributes {stable_mosaic.version = 11 : i64} {
  func.func @_mlp_kernel(%arg0: i32, %arg1: memref<8x64xf32, #tpu.memory_space<vmem>>, %arg2: memref<64x128xf32, #tpu.memory_space<vmem>>, %arg3: memref<1x128xf32, #tpu.memory_space<vmem>>, %arg4: memref<128x128xf32, #tpu.memory_space<vmem>>, %arg5: memref<1x128xf32, #tpu.memory_space<vmem>>, %arg6: memref<128x32xf32, #tpu.memory_space<vmem>>, %arg7: memref<1x32xf32, #tpu.memory_space<vmem>>, %arg8: memref<8x32xf32, #tpu.memory_space<vmem>>) attributes {dimension_semantics = [#tpu.dimension_semantics<parallel>], iteration_bounds = array<i64: 1>, scalar_prefetch = 0 : i64, scratch_operands = 0 : i64, tpu.core_type = #tpu.core_type<tc>, window_params = [{transform_indices = @transform_0, window_bounds = array<i64: 8, 64>}, {pipeline_mode = #tpu.pipeline_mode<synchronous>, transform_indices = @transform_1, window_bounds = array<i64: 64, 128>}, {pipeline_mode = #tpu.pipeline_mode<synchronous>, transform_indices = @transform_2, window_bounds = array<i64: 1, 128>}, {pipeline_mode = #tpu.pipeline_mode<synchronous>, transform_indices = @transform_3, window_bounds = array<i64: 128, 128>}, {pipeline_mode = #tpu.pipeline_mode<synchronous>, transform_indices = @transform_4, window_bounds = array<i64: 1, 128>}, {pipeline_mode = #tpu.pipeline_mode<synchronous>, transform_indices = @transform_5, window_bounds = array<i64: 128, 32>}, {pipeline_mode = #tpu.pipeline_mode<synchronous>, transform_indices = @transform_6, window_bounds = array<i64: 1, 32>}, {transform_indices = @transform_7, window_bounds = array<i64: 8, 32>}]} {
    %c0 = arith.constant 0 : index
    %c0_0 = arith.constant 0 : index
    %0 = vector.load %arg1[%c0, %c0_0] : memref<8x64xf32, #tpu.memory_space<vmem>>, vector<8x64xf32>
    %c0_1 = arith.constant 0 : index
    %c0_2 = arith.constant 0 : index
    %1 = vector.load %arg2[%c0_1, %c0_2] : memref<64x128xf32, #tpu.memory_space<vmem>>, vector<64x128xf32>
    %cst = arith.constant dense<0.000000e+00> : vector<8x128xf32>
    %2 = tpu.matmul %0, %1, %cst {dimension_numbers = #tpu.dot_dimension_numbers<[1], [0], [0], [1], [0, 0, 1, 1], [], []>} : vector<8x64xf32>, vector<64x128xf32>, vector<8x128xf32> -> vector<8x128xf32>
    %c0_3 = arith.constant 0 : index
    %c0_4 = arith.constant 0 : index
    %3 = vector.load %arg3[%c0_3, %c0_4] : memref<1x128xf32, #tpu.memory_space<vmem>>, vector<1x128xf32>
    %4 = vector.broadcast %3 : vector<1x128xf32> to vector<8x128xf32>
    %5 = arith.addf %2, %4 : vector<8x128xf32>
    %cst_5 = arith.constant 0.000000e+00 : f32
    %6 = vector.broadcast %cst_5 : f32 to vector<8x128xf32>
    %7 = arith.maximumf %5, %6 : vector<8x128xf32>
    %c0_6 = arith.constant 0 : index
    %c0_7 = arith.constant 0 : index
    %8 = vector.load %arg4[%c0_6, %c0_7] : memref<128x128xf32, #tpu.memory_space<vmem>>, vector<128x128xf32>
    %cst_8 = arith.constant dense<0.000000e+00> : vector<8x128xf32>
    %9 = tpu.matmul %7, %8, %cst_8 {dimension_numbers = #tpu.dot_dimension_numbers<[1], [0], [0], [1], [0, 0, 1, 1], [], []>} : vector<8x128xf32>, vector<128x128xf32>, vector<8x128xf32> -> vector<8x128xf32>
    %c0_9 = arith.constant 0 : index
    %c0_10 = arith.constant 0 : index
    %10 = vector.load %arg5[%c0_9, %c0_10] : memref<1x128xf32, #tpu.memory_space<vmem>>, vector<1x128xf32>
    %11 = vector.broadcast %10 : vector<1x128xf32> to vector<8x128xf32>
    %12 = arith.addf %9, %11 : vector<8x128xf32>
    %cst_11 = arith.constant 0.000000e+00 : f32
    %13 = vector.broadcast %cst_11 : f32 to vector<8x128xf32>
    %14 = arith.maximumf %12, %13 : vector<8x128xf32>
    %c0_12 = arith.constant 0 : index
    %c0_13 = arith.constant 0 : index
    %15 = vector.load %arg6[%c0_12, %c0_13] : memref<128x32xf32, #tpu.memory_space<vmem>>, vector<128x32xf32>
    %cst_14 = arith.constant dense<0.000000e+00> : vector<8x32xf32>
    %16 = tpu.matmul %14, %15, %cst_14 {dimension_numbers = #tpu.dot_dimension_numbers<[1], [0], [0], [1], [0, 0, 1, 1], [], []>} : vector<8x128xf32>, vector<128x32xf32>, vector<8x32xf32> -> vector<8x32xf32>
    %c0_15 = arith.constant 0 : index
    %c0_16 = arith.constant 0 : index
    %17 = vector.load %arg7[%c0_15, %c0_16] : memref<1x32xf32, #tpu.memory_space<vmem>>, vector<1x32xf32>
    %18 = vector.broadcast %17 : vector<1x32xf32> to vector<8x32xf32>
    %19 = arith.addf %16, %18 : vector<8x32xf32>
    %c0_17 = arith.constant 0 : index
    %c0_18 = arith.constant 0 : index
    %20 = vector.load %arg8[%c0_17, %c0_18] : memref<8x32xf32, #tpu.memory_space<vmem>>, vector<8x32xf32>
    tpu.vector_store %arg8[%c0_17, %c0_18], %19 {strides = array<i32>} : memref<8x32xf32, #tpu.memory_space<vmem>>, vector<8x32xf32>,
    return
  }
  func.func @transform_0(%arg0: i32) -> (i32, i32) {
    %c0_i32 = arith.constant 0 : i32
    %c0_i32_0 = arith.constant 0 : i32
    return %arg0, %c0_i32 : i32, i32
  }
  func.func @transform_1(%arg0: i32) -> (i32, i32) {
    %c0_i32 = arith.constant 0 : i32
    %c0_i32_0 = arith.constant 0 : i32
    %c0_i32_1 = arith.constant 0 : i32
    return %c0_i32, %c0_i32_0 : i32, i32
  }
  func.func @transform_2(%arg0: i32) -> (i32, i32) {
    %c0_i32 = arith.constant 0 : i32
    %c0_i32_0 = arith.constant 0 : i32
    %c0_i32_1 = arith.constant 0 : i32
    return %c0_i32, %c0_i32_0 : i32, i32
  }
  func.func @transform_3(%arg0: i32) -> (i32, i32) {
    %c0_i32 = arith.constant 0 : i32
    %c0_i32_0 = arith.constant 0 : i32
    %c0_i32_1 = arith.constant 0 : i32
    return %c0_i32, %c0_i32_0 : i32, i32
  }
  func.func @transform_4(%arg0: i32) -> (i32, i32) {
    %c0_i32 = arith.constant 0 : i32
    %c0_i32_0 = arith.constant 0 : i32
    %c0_i32_1 = arith.constant 0 : i32
    return %c0_i32, %c0_i32_0 : i32, i32
  }
  func.func @transform_5(%arg0: i32) -> (i32, i32) {
    %c0_i32 = arith.constant 0 : i32
    %c0_i32_0 = arith.constant 0 : i32
    %c0_i32_1 = arith.constant 0 : i32
    return %c0_i32, %c0_i32_0 : i32, i32
  }
  func.func @transform_6(%arg0: i32) -> (i32, i32) {
    %c0_i32 = arith.constant 0 : i32
    %c0_i32_0 = arith.constant 0 : i32
    %c0_i32_1 = arith.constant 0 : i32
    return %c0_i32, %c0_i32_0 : i32, i32
  }
  func.func @transform_7(%arg0: i32) -> (i32, i32) {
    %c0_i32 = arith.constant 0 : i32
    %c0_i32_0 = arith.constant 0 : i32
    return %arg0, %c0_i32 : i32, i32
  }
}

</mosaic_0001>

<bundles_post_ra>
// kernel: tpu_custom_call.1
= control target key start
LH: loop header
LB: loop body
LE: loop exit
PB: predicated region body
PF: predicated region fallthrough
CT: control target
= control target key end

     0   :  { %12 = vsyncpa [#allocation3], 0  ;;  %s399_s0 = inlined_call_operand.vmem [shape: f32[8,64], index: 0, kind: input, shape index: {}]   ;;  %s400_s1 = inlined_call_operand.hbm [shape: f32[64,128], index: 1, kind: input, shape index: {}]   ;;  %s401_s2 = inlined_call_operand.vmem [shape: f32[1,128], index: 2, kind: input, shape index: {}]   ;;  %s402_s3 = inlined_call_operand.vmem [shape: f32[128,128], index: 3, kind: input, shape index: {}]   ;;  %s403_s4 = inlined_call_operand.vmem [shape: f32[1,128], index: 4, kind: input, shape index: {}]   ;;  %s404_s5 = inlined_call_operand.vmem [shape: f32[128,32], index: 5, kind: input, shape index: {}]   ;;  %s405_s6 = inlined_call_operand.vmem [shape: f32[1,32], index: 6, kind: input, shape index: {}]   ;;  %s406_s7 = inlined_call_operand.hbm [shape: f32[8,32], index: 7, kind: output, shape index: {}]  }
   0x1   :  { %13 = vsyncpa [#allocation4], 0  ;;  %s20_s26 = sshll.u32 %s400_s1, 4  ;;  %s241_s27 = smov [#allocation2]   ;;  %s21_s26 = int_to_ptr.hbm [resolvable:$true] %s20_s26 }
   0x2   :  { %s22_s28 = sshll.u32 %s241_s27, 4  ;;  %s242_s29 = smov 128   ;;  %s23_s28 = int_to_ptr.vmem [resolvable:$true] %s22_s28 }
   0x3   :  { %s243_s30 = smov 8  }
   0x4   :  { %28 = dma.hbm_to_vmem [thread:$0]  %s21_s26, 1024, %s23_s28, [#allocation3], %s242_s29, %s242_s29, %s243_s30  }
   0x5   :  { %237 = dma.done.wait [#allocation3], 1024  }
   0x6   :  { %238 = vsyncadd [#allocation3], 4294966272  ;;  %v51_v0 = vld [vmem:[#allocation2 + $0x38] sm:$0xff]  ;;  %v50_v1 = vld [vmem:[#allocation2 + $0x30] sm:$0xff]  ;;  %vm56_vm0 = vcmask 523264   ;;  %s244_s26 = smov [#allocation5]  }
   0x7   :  { %68 = vmatpush.msra.mxu0 %v51_v0  ;;  %v49_v2 = vld [vmem:[#allocation2 + $0x28] sm:$0xff]  ;;  %v96_v3 = vld [vmem:[%s402_s3 + $0x78] sm:$0xff]  ;;  %v95_v4 = vld [vmem:[%s402_s3 + $0x70] sm:$0xff]  ;;  %s169_s27 = sshll.u32 %s244_s26, 4  ;;  %s171_s29 = sshll.u32 %s406_s7, 4  ;;  %vm162_vm1 = vcmask 261120   ;;  %s170_s27 = int_to_ptr.vmem [resolvable:$true] %s169_s27  ;;  %s172_s29 = int_to_ptr.hbm [resolvable:$true] %s171_s29 }
   0x8   :  { %v48_v5 = vld [vmem:[#allocation2 + $0x20] sm:$0xff]  ;;  %101 = vmatpush.msra.mxu1 %v96_v3  ;;  %v94_v6 = vld [vmem:[%s402_s3 + $0x68] sm:$0xff]  ;;  %v47_v7 = vld [vmem:[#allocation2 + $0x18] sm:$0xff] }
   0x9   :  { %69 = vmatpush.msra.mxu0 %v50_v1  ;;  %v93_v8 = vld [vmem:[%s402_s3 + $0x60] sm:$0xff]  ;;  %v46_v9 = vld [vmem:[#allocation2 + $0x10] sm:$0xff]  ;;  %v92_v10 = vld [vmem:[%s402_s3 + $0x58] sm:$0xff] }
   0xa   :  { %102 = vmatpush.msra.mxu1 %v95_v4  ;;  %v45_v11 = vld [vmem:[#allocation2 + $0x8] sm:$0xff]  ;;  %v91_v12 = vld [vmem:[%s402_s3 + $0x50] sm:$0xff]  ;;  %v44_v13 = vld [vmem:[#allocation2] sm:$0xff] }
   0xb   :  { %70 = vmatpush.msra.mxu0 %v49_v2  ;;  %v43_v14 = vld [vmem:[%s399_s0] sm:$0xff]  ;;  %v90_v15 = vld [vmem:[%s402_s3 + $0x48] sm:$0xff]  ;;  %v88_v17 = vld [vmem:[%s402_s3 + $0x38] sm:$0xff] }
   0xc   :  { %103 = vmatpush.msra.mxu1 %v94_v6  ;;  %v89_v16 = vld [vmem:[%s402_s3 + $0x40] sm:$0xff]  ;;  %v87_v18 = vld [vmem:[%s402_s3 + $0x30] sm:$0xff]  ;;  %v86_v19 = vld [vmem:[%s402_s3 + $0x28] sm:$0xff] }
   0xd   :  { %71 = vmatpush.msra.mxu0 %v48_v5  ;;  %v85_v20 = vld [vmem:[%s402_s3 + $0x20] sm:$0xff]  ;;  %v84_v21 = vld [vmem:[%s402_s3 + $0x18] sm:$0xff]  ;;  %v83_v22 = vld [vmem:[%s402_s3 + $0x10] sm:$0xff] }
   0xe   :  { %104 = vmatpush.msra.mxu1 %v93_v8  ;;  %v82_v23 = vld [vmem:[%s402_s3 + $0x8] sm:$0xff]  ;;  %v81_v24 = vld [vmem:[%s402_s3] sm:$0xff]  ;;  %v137_v25 = vld [vmem:[%s404_s5 + $0x78] sm:$0xff] }
   0xf   :  { %72 = vmatpush.msra.mxu0 %v47_v7  ;;  %v136_v26 = vld [vmem:[%s404_s5 + $0x70] sm:$0xff]  ;;  %142 = vmatpush.msra.mxu2 %v137_v25  ;;  %v135_v27 = vld [vmem:[%s404_s5 + $0x68] sm:$0xff]  ;;  %v134_v28 = vld [vmem:[%s404_s5 + $0x60] sm:$0xff] }
  0x10   :  { %105 = vmatpush.msra.mxu1 %v92_v10  ;;  %v133_v29 = vld [vmem:[%s404_s5 + $0x58] sm:$0xff]  ;;  %v132_v30 = vld [vmem:[%s404_s5 + $0x50] sm:$0xff]  ;;  %v131_v31 = vld [vmem:[%s404_s5 + $0x48] sm:$0xff] }
  0x11   :  { %73 = vmatpush.msra.mxu0 %v46_v9  ;;  %143 = vmatpush.msra.mxu2 %v136_v26  ;;  %v130_v32 = vld [vmem:[%s404_s5 + $0x40] sm:$0xff]  ;;  %v129_v33 = vld [vmem:[%s404_s5 + $0x38] sm:$0xff]  ;;  %v128_v34 = vld [vmem:[%s404_s5 + $0x30] sm:$0xff] }
  0x12   :  { %106 = vmatpush.msra.mxu1 %v91_v12  ;;  %v127_v35 = vld [vmem:[%s404_s5 + $0x28] sm:$0xff]  ;;  %v126_v36 = vld [vmem:[%s404_s5 + $0x20] sm:$0xff]  ;;  %v125_v37 = vld [vmem:[%s404_s5 + $0x18] sm:$0xff] }
  0x13   :  { %74 = vmatpush.msra.mxu0 %v45_v11  ;;  %144 = vmatpush.msra.mxu2 %v135_v27  ;;  %v186_v38 = vld [vmem:[%s401_s2] ss:$0 sm:$0xff]  ;;  %v124_v42 = vld [vmem:[%s404_s5 + $0x10] sm:$0xff]  ;;  %v123_v43 = vld [vmem:[%s404_s5 + $0x8] sm:$0xff] }
  0x14   :  { %107 = vmatpush.msra.mxu1 %v90_v15  ;;  %v122_v44 = vld [vmem:[%s404_s5] sm:$0xff] }
  0x15   :  { %75 = vmatpush.msra.mxu0 %v44_v13  ;;  %145 = vmatpush.msra.mxu2 %v134_v28  ;;  %v187_v45 = vld [vmem:[%s403_s4] ss:$0 sm:$0xff] }
  0x16   :  { %181 = vmatmul.msk.f32.vlgmr.msra.gmra.mxu0 %vm56_vm0, %v43_v14  ;;  %108 = vmatpush.msra.mxu1 %v89_v16  ;;  %v188_v49 = vld [vmem:[%s405_s6] ss:$0 sm:$0xff] }
  0x17   :  { %146 = vmatpush.msra.mxu2 %v133_v29 }
  0x18   :  { %109 = vmatpush.msra.mxu1 %v88_v17 }
  0x19   :  { %147 = vmatpush.msra.mxu2 %v132_v30 }
  0x1a   :  { %110 = vmatpush.msra.mxu1 %v87_v18 }
  0x1b   :  { %148 = vmatpush.msra.mxu2 %v131_v31 }
  0x1c   :  { %111 = vmatpush.msra.mxu1 %v86_v19 }
  0x1d   :  { %149 = vmatpush.msra.mxu2 %v130_v32 }
  0x1e   :  { %112 = vmatpush.msra.mxu1 %v85_v20 }
  0x1f   :  { %150 = vmatpush.msra.mxu2 %v129_v33 }
  0x20   :  { %113 = vmatpush.msra.mxu1 %v84_v21 }
  0x21   :  { %151 = vmatpush.msra.mxu2 %v128_v34 }
  0x22   :  { %114 = vmatpush.msra.mxu1 %v83_v22 }
  0x23   :  { %152 = vmatpush.msra.mxu2 %v127_v35 }
  0x24   :  { %115 = vmatpush.msra.mxu1 %v82_v23 }
  0x25   :  { %153 = vmatpush.msra.mxu2 %v126_v36 }
  0x26   :  { %116 = vmatpush.msra.mxu1 %v81_v24 }
  0x27   :  { %154 = vmatpush.msra.mxu2 %v125_v37 }
  0x29   :  { %155 = vmatpush.msra.mxu2 %v124_v42 }
  0x2b   :  { %156 = vmatpush.msra.mxu2 %v123_v43 }
  0x2d   :  { %157 = vmatpush.msra.mxu2 %v122_v44 }
  0x93   :  { %v77_v39 = vpop.f32.mrf.mxu0 }
  0x94   :  { %v78_v40 = vadd.f32 %v186_v38, %v77_v39 }
  0x96   :  { %v80_v41 = vmax.f32 %v78_v40, 0.0 }
  0x98   :  { %117 = vmatmul.f32.vlgmr.msra.gmra.mxu1 %v80_v41 }
 0x115   :  { %v118_v46 = vpop.f32.mrf.mxu1 }
 0x116   :  { %v119_v47 = vadd.f32 %v187_v45, %v118_v46 }
 0x118   :  { %v121_v48 = vmax.f32 %v119_v47, 0.0 }
 0x11a   :  { %158 = vmatmul.f32.vlgmr.msra.gmra.mxu2 %v121_v48 }
 0x19d   :  { %v159_v50 = vpop.f32.mrf.mxu2 }
 0x19e   :  { %v160_v51 = vadd.f32 %v188_v49, %v159_v50 }
 0x1a0   :  { %163 = vst.msk [vmem:[#allocation5] sm:$0xff] %vm162_vm1, %v160_v51 }
 0x1a1   :  { %174 = dma.vmem_to_hbm [thread:$0]  %s170_s27, 128, %s172_s29, [#allocation4]  }
 0x1a2   :  { %239 = dma.done.wait [#allocation4], 128  }
 0x1a3   :  { %240 = vsyncadd [#allocation4], 4294967168 }
 0x1a4   :  { %179 = vsyncpa [#allocation3], 1 }
 0x1a5   :  { %180 = vsyncpa [#allocation4], 1 }

</bundles_post_ra>
